<compile_context>
chip_gen: v6e
topology: v6e:2x2x1
jax: 0.10.0
libtpu: 0.0.40
codegen_flags: <defaults>
</compile_context>

<pallas_src>
import jax
import jax.numpy as jnp
from jax.experimental import pallas as pl
from jax.experimental.pallas import tpu as pltpu

BN_EPS = 1e-5
# Lane-padding target for feature dims.  128 matches the vreg lane width (and
# the v5e MXU); use 256 on v6e/v7x if hidden sizes ever grow into
# compute-relevant territory (their MXUs are 2x256).
LANE = 128


def _round_up(n, m):
    return ((n + m - 1) // m) * m


def _batchnorm_train_f32(x, gamma, beta):
    """Training-mode BatchNorm1d: batch stats, biased variance, eps=1e-5 (f32).

    Single pass over x (sum and sum-of-squares); the affine is folded into one
    per-column scale/shift so the (B,N)-sized work is a single multiply-add.
    For all-zero padded columns (gamma = beta = 0) the output stays exactly 0.
    """
    inv_b = jnp.float32(1.0 / x.shape[0])
    mean = jnp.sum(x, axis=0, keepdims=True) * inv_b
    mean_sq = jnp.sum(x * x, axis=0, keepdims=True) * inv_b
    var = jnp.maximum(mean_sq - mean * mean, 0.0)
    scale = gamma * jax.lax.rsqrt(var + BN_EPS)
    shift = beta - mean * scale
    return x * scale + shift


def decoder_kernel(
    z_ref,
    w1_ref, b1_ref, g1_ref, be1_ref,
    w2_ref, g2_ref, be2_ref,
    w3_ref, g3_ref, be3_ref,
    w4_ref, b4_ref,
    out_ref,
):
    # z is f32 and unpadded; cast to bf16 in-kernel (avoids wrapper-side ops).
    # Weights are bf16 and lane-padded; biases / BN params are f32.
    z = z_ref[...].astype(jnp.bfloat16)

    # Block 1: Linear -> ReLU -> BatchNorm
    h = jnp.dot(z, w1_ref[...], preferred_element_type=jnp.float32) + b1_ref[...]
    h = jnp.maximum(h, 0.0)
    h = _batchnorm_train_f32(h, g1_ref[...], be1_ref[...])

    # Block 2: Linear -> BatchNorm -> ReLU
    # (b2 dropped: a bias added right before BN is cancelled by the mean.)
    h = jnp.dot(h.astype(jnp.bfloat16), w2_ref[...],
                preferred_element_type=jnp.float32)
    h = _batchnorm_train_f32(h, g2_ref[...], be2_ref[...])
    h = jnp.maximum(h, 0.0)

    # Block 3: Linear -> BatchNorm -> ReLU  (b3 likewise dropped)
    h = jnp.dot(h.astype(jnp.bfloat16), w3_ref[...],
                preferred_element_type=jnp.float32)
    h = _batchnorm_train_f32(h, g3_ref[...], be3_ref[...])
    h = jnp.maximum(h, 0.0)

    # Output projection (lane-dense padded output; real cols sliced outside).
    out = jnp.dot(h.astype(jnp.bfloat16), w4_ref[...],
                  preferred_element_type=jnp.float32) + b4_ref[...]
    out_ref[...] = out.astype(out_ref.dtype)


def _pad2(a, rows, cols, dtype):
    out = jnp.zeros((rows, cols), dtype)
    return out.at[: a.shape[0], : a.shape[1]].set(a.astype(dtype))


def prepare_decoder_params(params, lane=LANE):
    """Pad feature dims to a lane multiple, cast weights to bf16.

    w1 keeps its K dim (nz) unpadded because z is fed unpadded; b2/b3 are
    dropped entirely (cancelled by the following BatchNorm).  Keep padded
    gamma/beta/bias columns exactly zero so padded columns stay zero.
    """
    prepped = {}
    nz = params["w1"].shape[0]
    prepped["w1"] = _pad2(params["w1"], nz,
                          _round_up(params["w1"].shape[1], lane), jnp.bfloat16)
    prepped["b1"] = _pad2(params["b1"], 1,
                          _round_up(params["b1"].shape[1], lane), jnp.float32)
    for i in (2, 3, 4):
        w = params[f"w{i}"]
        prepped[f"w{i}"] = _pad2(w, _round_up(w.shape[0], lane),
                                 _round_up(w.shape[1], lane), jnp.bfloat16)
    prepped["b4"] = _pad2(params["b4"], 1,
                          _round_up(params["b4"].shape[1], lane), jnp.float32)
    for i in (1, 2, 3):
        g, be = params[f"g{i}"], params[f"be{i}"]
        rout = _round_up(g.shape[1], lane)
        prepped[f"g{i}"] = _pad2(g, 1, rout, jnp.float32)
        prepped[f"be{i}"] = _pad2(be, 1, rout, jnp.float32)
    return prepped


def decoder_forward(z, prepped, data_size):
    """z: (B, nz) f32 (unpadded).  prepped: output of prepare_decoder_params."""
    B = z.shape[0]
    out_pad = prepped["w4"].shape[1]

    args = (
        z,
        prepped["w1"], prepped["b1"], prepped["g1"], prepped["be1"],
        prepped["w2"], prepped["g2"], prepped["be2"],
        prepped["w3"], prepped["g3"], prepped["be3"],
        prepped["w4"], prepped["b4"],
    )
    vmem_spec = pl.BlockSpec(memory_space=pltpu.MemorySpace.VMEM)
    out_padded = pl.pallas_call(
        decoder_kernel,
        out_shape=jax.ShapeDtypeStruct((B, out_pad), jnp.float32),
        in_specs=[vmem_spec] * len(args),
        out_specs=vmem_spec,
        compiler_params=pltpu.CompilerParams(vmem_limit_bytes=16 * 1024 * 1024),
    )(*args)
    # Consumers that tolerate the lane-padded slab can use out_padded directly
    # and skip this XLA slice/copy.
    return out_padded[:, :data_size]


def init_decoder_params(key, data_size, hidden_size, n_hidden, last_hidden=None):
    """Deterministic init mimicking PyTorch Linear defaults (U[-1/sqrt(fan_in), +])."""
    if last_hidden is None:
        last_hidden = n_hidden
    dims = [
        (hidden_size, last_hidden),
        (last_hidden, n_hidden),
        (n_hidden, n_hidden),
        (n_hidden, data_size),
    ]
    params = {}
    keys = jax.random.split(key, 2 * len(dims))
    for i, (fan_in, fan_out) in enumerate(dims, start=1):
        bound = 1.0 / jnp.sqrt(jnp.float32(fan_in))
        params[f"w{i}"] = jax.random.uniform(
            keys[2 * (i - 1)], (fan_in, fan_out), jnp.float32, -bound, bound)
        params[f"b{i}"] = jax.random.uniform(
            keys[2 * (i - 1) + 1], (1, fan_out), jnp.float32, -bound, bound)
    for i, (_, fan_out) in enumerate(dims[:3], start=1):
        params[f"g{i}"] = jnp.ones((1, fan_out), jnp.float32)
        params[f"be{i}"] = jnp.zeros((1, fan_out), jnp.float32)
    return params


def decoder_reference(z, params, matmul_dtype=jnp.float32):
    """Pure-JAX reference of the full module math (biases included).
    matmul_dtype=bf16 mirrors the kernel's MXU precision."""
    def bn(x, gamma, beta):
        mean = jnp.mean(x, axis=0, keepdims=True)
        xc = x - mean
        var = jnp.mean(xc * xc, axis=0, keepdims=True)
        return xc * jax.lax.rsqrt(var + BN_EPS) * gamma + beta

    cast = lambda a: a.astype(matmul_dtype)
    h = jnp.dot(cast(z), cast(params["w1"]),
                preferred_element_type=jnp.float32) + params["b1"]
    h = jnp.maximum(h, 0.0)
    h = bn(h, params["g1"], params["be1"])
    h = jnp.dot(cast(h), cast(params["w2"]),
                preferred_element_type=jnp.float32) + params["b2"]
    h = bn(h, params["g2"], params["be2"])
    h = jnp.maximum(h, 0.0)
    h = jnp.dot(cast(h), cast(params["w3"]),
                preferred_element_type=jnp.float32) + params["b3"]
    h = bn(h, params["g3"], params["be3"])
    h = jnp.maximum(h, 0.0)
    return jnp.dot(cast(h), cast(params["w4"]),
                   preferred_element_type=jnp.float32) + params["b4"]


if __name__ == "__main__":
    # Small shapes consistent with the module: batch=16 (fills a bf16 sublane
    # tile), hidden_size(nz)=32, n_hidden=64, last_hidden=64 (default), data_size=48.
    B, NZ, N_HIDDEN, DATA = 16, 32, 64, 48

    key = jax.random.PRNGKey(0)
    kz, kp = jax.random.split(key)
    z = jax.random.normal(kz, (B, NZ), jnp.float32)
    params = init_decoder_params(kp, data_size=DATA, hidden_size=NZ,
                                 n_hidden=N_HIDDEN, last_hidden=None)
    prepped = prepare_decoder_params(params)

    out = decoder_forward(z, prepped, data_size=DATA)
    out = jax.block_until_ready(out)
    assert out.shape == (B, DATA), out.shape

    # Tight check against a reference using the same bf16 MXU inputs (the
    # reference keeps b2/b3; they are mathematically cancelled by BN).
    ref_bf16 = decoder_reference(z, params, matmul_dtype=jnp.bfloat16)
    assert jnp.allclose(out, ref_bf16, atol=5e-3, rtol=5e-3), \
        float(jnp.max(jnp.abs(out - ref_bf16)))

    # Looser semantic check against the full-f32 module math.
    ref_f32 = decoder_reference(z, params, matmul_dtype=jnp.float32)
    assert jnp.allclose(out, ref_f32, atol=1e-1, rtol=1e-1), \
        float(jnp.max(jnp.abs(out - ref_f32)))

    print("KERNEL_OK")
</pallas_src>

<mosaic_0001>
module attributes {stable_mosaic.version = 11 : i64} {
  func.func @decoder_kernel(%arg0: memref<16x32xf32, #tpu.memory_space<vmem>>, %arg1: memref<32x128xbf16, #tpu.memory_space<vmem>>, %arg2: memref<1x128xf32, #tpu.memory_space<vmem>>, %arg3: memref<1x128xf32, #tpu.memory_space<vmem>>, %arg4: memref<1x128xf32, #tpu.memory_space<vmem>>, %arg5: memref<128x128xbf16, #tpu.memory_space<vmem>>, %arg6: memref<1x128xf32, #tpu.memory_space<vmem>>, %arg7: memref<1x128xf32, #tpu.memory_space<vmem>>, %arg8: memref<128x128xbf16, #tpu.memory_space<vmem>>, %arg9: memref<1x128xf32, #tpu.memory_space<vmem>>, %arg10: memref<1x128xf32, #tpu.memory_space<vmem>>, %arg11: memref<128x128xbf16, #tpu.memory_space<vmem>>, %arg12: memref<1x128xf32, #tpu.memory_space<vmem>>, %arg13: memref<16x128xf32, #tpu.memory_space<vmem>>) attributes {dimension_semantics = [], scalar_prefetch = 0 : i64, scratch_operands = 0 : i64, tpu.core_type = #tpu.core_type<tc>} {
    %c0 = arith.constant 0 : index
    %c0_0 = arith.constant 0 : index
    %0 = vector.load %arg0[%c0, %c0_0] : memref<16x32xf32, #tpu.memory_space<vmem>>, vector<16x32xf32>
    %1 = arith.truncf %0 : vector<16x32xf32> to vector<16x32xbf16>
    %c0_1 = arith.constant 0 : index
    %c0_2 = arith.constant 0 : index
    %2 = vector.load %arg1[%c0_1, %c0_2] : memref<32x128xbf16, #tpu.memory_space<vmem>>, vector<32x128xbf16>
    %cst = arith.constant dense<0.000000e+00> : vector<16x128xf32>
    %3 = tpu.matmul %1, %2, %cst {dimension_numbers = #tpu.dot_dimension_numbers<[1], [0], [0], [1], [0, 0, 1, 1], [], []>} : vector<16x32xbf16>, vector<32x128xbf16>, vector<16x128xf32> -> vector<16x128xf32>
    %c0_3 = arith.constant 0 : index
    %c0_4 = arith.constant 0 : index
    %4 = vector.load %arg2[%c0_3, %c0_4] : memref<1x128xf32, #tpu.memory_space<vmem>>, vector<1x128xf32>
    %5 = vector.broadcast %4 : vector<1x128xf32> to vector<16x128xf32>
    %6 = arith.addf %3, %5 : vector<16x128xf32>
    %cst_5 = arith.constant 0.000000e+00 : f32
    %7 = vector.broadcast %cst_5 : f32 to vector<16x128xf32>
    %8 = arith.maximumf %6, %7 : vector<16x128xf32>
    %c0_6 = arith.constant 0 : index
    %c0_7 = arith.constant 0 : index
    %9 = vector.load %arg3[%c0_6, %c0_7] : memref<1x128xf32, #tpu.memory_space<vmem>>, vector<1x128xf32>
    %c0_8 = arith.constant 0 : index
    %c0_9 = arith.constant 0 : index
    %10 = vector.load %arg4[%c0_8, %c0_9] : memref<1x128xf32, #tpu.memory_space<vmem>>, vector<1x128xf32>
    %cst_10 = arith.constant dense<0.000000e+00> : vector<128xf32>
    %11 = vector.multi_reduction <add>, %8, %cst_10 [0] : vector<16x128xf32> to vector<128xf32>
    %12 = vector.shape_cast %11 : vector<128xf32> to vector<1x128xf32>
    %cst_11 = arith.constant 6.250000e-02 : f32
    %13 = vector.broadcast %cst_11 : f32 to vector<1x128xf32>
    %14 = arith.mulf %12, %13 : vector<1x128xf32>
    %15 = arith.mulf %8, %8 : vector<16x128xf32>
    %cst_12 = arith.constant dense<0.000000e+00> : vector<128xf32>
    %16 = vector.multi_reduction <add>, %15, %cst_12 [0] : vector<16x128xf32> to vector<128xf32>
    %17 = vector.shape_cast %16 : vector<128xf32> to vector<1x128xf32>
    %cst_13 = arith.constant 6.250000e-02 : f32
    %18 = vector.broadcast %cst_13 : f32 to vector<1x128xf32>
    %19 = arith.mulf %17, %18 : vector<1x128xf32>
    %20 = arith.mulf %14, %14 : vector<1x128xf32>
    %21 = arith.subf %19, %20 : vector<1x128xf32>
    %cst_14 = arith.constant 0.000000e+00 : f32
    %22 = vector.broadcast %cst_14 : f32 to vector<1x128xf32>
    %23 = arith.maximumf %21, %22 : vector<1x128xf32>
    %cst_15 = arith.constant 9.99999974E-6 : f32
    %24 = vector.broadcast %cst_15 : f32 to vector<1x128xf32>
    %25 = arith.addf %23, %24 : vector<1x128xf32>
    %26 = math.rsqrt %25 : vector<1x128xf32>
    %27 = arith.mulf %9, %26 : vector<1x128xf32>
    %28 = arith.mulf %14, %27 : vector<1x128xf32>
    %29 = arith.subf %10, %28 : vector<1x128xf32>
    %30 = vector.broadcast %27 : vector<1x128xf32> to vector<16x128xf32>
    %31 = arith.mulf %8, %30 : vector<16x128xf32>
    %32 = vector.broadcast %29 : vector<1x128xf32> to vector<16x128xf32>
    %33 = arith.addf %31, %32 : vector<16x128xf32>
    %34 = arith.truncf %33 : vector<16x128xf32> to vector<16x128xbf16>
    %c0_16 = arith.constant 0 : index
    %c0_17 = arith.constant 0 : index
    %35 = vector.load %arg5[%c0_16, %c0_17] : memref<128x128xbf16, #tpu.memory_space<vmem>>, vector<128x128xbf16>
    %cst_18 = arith.constant dense<0.000000e+00> : vector<16x128xf32>
    %36 = tpu.matmul %34, %35, %cst_18 {dimension_numbers = #tpu.dot_dimension_numbers<[1], [0], [0], [1], [0, 0, 1, 1], [], []>} : vector<16x128xbf16>, vector<128x128xbf16>, vector<16x128xf32> -> vector<16x128xf32>
    %c0_19 = arith.constant 0 : index
    %c0_20 = arith.constant 0 : index
    %37 = vector.load %arg6[%c0_19, %c0_20] : memref<1x128xf32, #tpu.memory_space<vmem>>, vector<1x128xf32>
    %c0_21 = arith.constant 0 : index
    %c0_22 = arith.constant 0 : index
    %38 = vector.load %arg7[%c0_21, %c0_22] : memref<1x128xf32, #tpu.memory_space<vmem>>, vector<1x128xf32>
    %cst_23 = arith.constant dense<0.000000e+00> : vector<128xf32>
    %39 = vector.multi_reduction <add>, %36, %cst_23 [0] : vector<16x128xf32> to vector<128xf32>
    %40 = vector.shape_cast %39 : vector<128xf32> to vector<1x128xf32>
    %cst_24 = arith.constant 6.250000e-02 : f32
    %41 = vector.broadcast %cst_24 : f32 to vector<1x128xf32>
    %42 = arith.mulf %40, %41 : vector<1x128xf32>
    %43 = arith.mulf %36, %36 : vector<16x128xf32>
    %cst_25 = arith.constant dense<0.000000e+00> : vector<128xf32>
    %44 = vector.multi_reduction <add>, %43, %cst_25 [0] : vector<16x128xf32> to vector<128xf32>
    %45 = vector.shape_cast %44 : vector<128xf32> to vector<1x128xf32>
    %cst_26 = arith.constant 6.250000e-02 : f32
    %46 = vector.broadcast %cst_26 : f32 to vector<1x128xf32>
    %47 = arith.mulf %45, %46 : vector<1x128xf32>
    %48 = arith.mulf %42, %42 : vector<1x128xf32>
    %49 = arith.subf %47, %48 : vector<1x128xf32>
    %cst_27 = arith.constant 0.000000e+00 : f32
    %50 = vector.broadcast %cst_27 : f32 to vector<1x128xf32>
    %51 = arith.maximumf %49, %50 : vector<1x128xf32>
    %cst_28 = arith.constant 9.99999974E-6 : f32
    %52 = vector.broadcast %cst_28 : f32 to vector<1x128xf32>
    %53 = arith.addf %51, %52 : vector<1x128xf32>
    %54 = math.rsqrt %53 : vector<1x128xf32>
    %55 = arith.mulf %37, %54 : vector<1x128xf32>
    %56 = arith.mulf %42, %55 : vector<1x128xf32>
    %57 = arith.subf %38, %56 : vector<1x128xf32>
    %58 = vector.broadcast %55 : vector<1x128xf32> to vector<16x128xf32>
    %59 = arith.mulf %36, %58 : vector<16x128xf32>
    %60 = vector.broadcast %57 : vector<1x128xf32> to vector<16x128xf32>
    %61 = arith.addf %59, %60 : vector<16x128xf32>
    %cst_29 = arith.constant 0.000000e+00 : f32
    %62 = vector.broadcast %cst_29 : f32 to vector<16x128xf32>
    %63 = arith.maximumf %61, %62 : vector<16x128xf32>
    %64 = arith.truncf %63 : vector<16x128xf32> to vector<16x128xbf16>
    %c0_30 = arith.constant 0 : index
    %c0_31 = arith.constant 0 : index
    %65 = vector.load %arg8[%c0_30, %c0_31] : memref<128x128xbf16, #tpu.memory_space<vmem>>, vector<128x128xbf16>
    %cst_32 = arith.constant dense<0.000000e+00> : vector<16x128xf32>
    %66 = tpu.matmul %64, %65, %cst_32 {dimension_numbers = #tpu.dot_dimension_numbers<[1], [0], [0], [1], [0, 0, 1, 1], [], []>} : vector<16x128xbf16>, vector<128x128xbf16>, vector<16x128xf32> -> vector<16x128xf32>
    %c0_33 = arith.constant 0 : index
    %c0_34 = arith.constant 0 : index
    %67 = vector.load %arg9[%c0_33, %c0_34] : memref<1x128xf32, #tpu.memory_space<vmem>>, vector<1x128xf32>
    %c0_35 = arith.constant 0 : index
    %c0_36 = arith.constant 0 : index
    %68 = vector.load %arg10[%c0_35, %c0_36] : memref<1x128xf32, #tpu.memory_space<vmem>>, vector<1x128xf32>
    %cst_37 = arith.constant dense<0.000000e+00> : vector<128xf32>
    %69 = vector.multi_reduction <add>, %66, %cst_37 [0] : vector<16x128xf32> to vector<128xf32>
    %70 = vector.shape_cast %69 : vector<128xf32> to vector<1x128xf32>
    %cst_38 = arith.constant 6.250000e-02 : f32
    %71 = vector.broadcast %cst_38 : f32 to vector<1x128xf32>
    %72 = arith.mulf %70, %71 : vector<1x128xf32>
    %73 = arith.mulf %66, %66 : vector<16x128xf32>
    %cst_39 = arith.constant dense<0.000000e+00> : vector<128xf32>
    %74 = vector.multi_reduction <add>, %73, %cst_39 [0] : vector<16x128xf32> to vector<128xf32>
    %75 = vector.shape_cast %74 : vector<128xf32> to vector<1x128xf32>
    %cst_40 = arith.constant 6.250000e-02 : f32
    %76 = vector.broadcast %cst_40 : f32 to vector<1x128xf32>
    %77 = arith.mulf %75, %76 : vector<1x128xf32>
    %78 = arith.mulf %72, %72 : vector<1x128xf32>
    %79 = arith.subf %77, %78 : vector<1x128xf32>
    %cst_41 = arith.constant 0.000000e+00 : f32
    %80 = vector.broadcast %cst_41 : f32 to vector<1x128xf32>
    %81 = arith.maximumf %79, %80 : vector<1x128xf32>
    %cst_42 = arith.constant 9.99999974E-6 : f32
    %82 = vector.broadcast %cst_42 : f32 to vector<1x128xf32>
    %83 = arith.addf %81, %82 : vector<1x128xf32>
    %84 = math.rsqrt %83 : vector<1x128xf32>
    %85 = arith.mulf %67, %84 : vector<1x128xf32>
    %86 = arith.mulf %72, %85 : vector<1x128xf32>
    %87 = arith.subf %68, %86 : vector<1x128xf32>
    %88 = vector.broadcast %85 : vector<1x128xf32> to vector<16x128xf32>
    %89 = arith.mulf %66, %88 : vector<16x128xf32>
    %90 = vector.broadcast %87 : vector<1x128xf32> to vector<16x128xf32>
    %91 = arith.addf %89, %90 : vector<16x128xf32>
    %cst_43 = arith.constant 0.000000e+00 : f32
    %92 = vector.broadcast %cst_43 : f32 to vector<16x128xf32>
    %93 = arith.maximumf %91, %92 : vector<16x128xf32>
    %94 = arith.truncf %93 : vector<16x128xf32> to vector<16x128xbf16>
    %c0_44 = arith.constant 0 : index
    %c0_45 = arith.constant 0 : index
    %95 = vector.load %arg11[%c0_44, %c0_45] : memref<128x128xbf16, #tpu.memory_space<vmem>>, vector<128x128xbf16>
    %cst_46 = arith.constant dense<0.000000e+00> : vector<16x128xf32>
    %96 = tpu.matmul %94, %95, %cst_46 {dimension_numbers = #tpu.dot_dimension_numbers<[1], [0], [0], [1], [0, 0, 1, 1], [], []>} : vector<16x128xbf16>, vector<128x128xbf16>, vector<16x128xf32> -> vector<16x128xf32>
    %c0_47 = arith.constant 0 : index
    %c0_48 = arith.constant 0 : index
    %97 = vector.load %arg12[%c0_47, %c0_48] : memref<1x128xf32, #tpu.memory_space<vmem>>, vector<1x128xf32>
    %98 = vector.broadcast %97 : vector<1x128xf32> to vector<16x128xf32>
    %99 = arith.addf %96, %98 : vector<16x128xf32>
    %c0_49 = arith.constant 0 : index
    %c0_50 = arith.constant 0 : index
    %100 = vector.load %arg13[%c0_49, %c0_50] : memref<16x128xf32, #tpu.memory_space<vmem>>, vector<16x128xf32>
    tpu.vector_store %arg13[%c0_49, %c0_50], %99 {strides = array<i32>} : memref<16x128xf32, #tpu.memory_space<vmem>>, vector<16x128xf32>,
    return
  }
}

</mosaic_0001>

<bundles_post_ra>
// kernel: tpu_custom_call.1
= control target key start
LH: loop header
LB: loop body
LE: loop exit
PB: predicated region body
PF: predicated region fallthrough
CT: control target
= control target key end

     0   :  { %18 = vsyncpa [#allocation3], 0  ;;  %s1152_s0 = inlined_call_operand.hbm [shape: f32[16,32], index: 0, kind: input, shape index: {}]   ;;  %s1153_s1 = inlined_call_operand.hbm [shape: bf16[32,128], index: 1, kind: input, shape index: {}]   ;;  %s1154_s2 = inlined_call_operand.vmem [shape: f32[1,128], index: 2, kind: input, shape index: {}]   ;;  %s1155_s3 = inlined_call_operand.vmem [shape: f32[1,128], index: 3, kind: input, shape index: {}]   ;;  %s1156_s4 = inlined_call_operand.vmem [shape: f32[1,128], index: 4, kind: input, shape index: {}]   ;;  %s1157_s5 = inlined_call_operand.hbm [shape: bf16[128,128], index: 5, kind: input, shape index: {}]   ;;  %s1158_s6 = inlined_call_operand.vmem [shape: f32[1,128], index: 6, kind: input, shape index: {}]   ;;  %s1159_s7 = inlined_call_operand.vmem [shape: f32[1,128], index: 7, kind: input, shape index: {}]   ;;  %s1160_s8 = inlined_call_operand.hbm [shape: bf16[128,128], index: 8, kind: input, shape index: {}]   ;;  %s1161_s9 = inlined_call_operand.vmem [shape: f32[1,128], index: 9, kind: input, shape index: {}]   ;;  %s1162_s10 = inlined_call_operand.vmem [shape: f32[1,128], index: 10, kind: input, shape index: {}]   ;;  %s1163_s11 = inlined_call_operand.hbm [shape: bf16[128,128], index: 11, kind: input, shape index: {}]   ;;  %s1164_s12 = inlined_call_operand.vmem [shape: f32[1,128], index: 12, kind: input, shape index: {}]   ;;  %s1165_s13 = inlined_call_operand.hbm [shape: f32[16,128], index: 13, kind: output, shape index: {}]  }
   0x1   :  { %19 = vsyncpa [#allocation6], 0 }
   0x2   :  { %20 = vsyncpa [#allocation9], 0 }
   0x3   :  { %21 = vsyncpa [#allocation4], 0  ;;  %s968_s25 = smov [#allocation5]  }
   0x4   :  { %s39_s26 = sshll.u32 %s968_s25, 4  ;;  %s40_s26 = int_to_ptr.vmem [resolvable:$true] %s39_s26 }
   0x5   :  { %s848_s27 = scalar_lea.vmem %s40_s26, 256  ;;  %p853_p1 = scmp.lt.s32.totalorder %s40_s26, %s40_s26 }
   0x6   :  { %p849_p0 = scmp.ne.s32.totalorder %s40_s26, %s848_s27  ;;  %p854_p2 = scmp.lt.s32.totalorder %s848_s27, %s848_s27 }
   0x8   :  { %p855_p3 = por %p854_p2, %p853_p1 }
   0xa   :  { %p856_p4 = pnand %p855_p3, %p849_p0 }
   0xc   :  { %859 = shalt.err (!%p856_p4)
}
   0xd   :  { %s969_s28 = smov 64   ;;  %s970_s29 = smov 4  }
   0xe   :  { %45 = dma.hbm_to_vmem [thread:$0]  %s1153_s1, 256, %s40_s26, [#allocation6], %s969_s28, %s969_s28, %s970_s29  }
   0xf   :  { %s971_s15 = smov [#allocation8]   ;;  %s972_s17 = smov [#allocation2]  }
  0x10   :  { %s73_s16 = sshll.u32 %s971_s15, 4  ;;  %s27_s18 = sshll.u32 %s972_s17, 4  ;;  %s74_s16 = int_to_ptr.vmem [resolvable:$true] %s73_s16  ;;  %s28_s18 = int_to_ptr.vmem [resolvable:$true] %s27_s18 }
  0x11   :  { %s868_s19 = scalar_lea.vmem %s74_s16, 1024  ;;  %p873_p6 = scmp.lt.s32.totalorder %s74_s16, %s74_s16 }
  0x12   :  { %p869_p5 = scmp.ne.s32.totalorder %s74_s16, %s868_s19  ;;  %p874_p7 = scmp.lt.s32.totalorder %s868_s19, %s868_s19 }
  0x14   :  { %p875_p8 = por %p874_p7, %p873_p6 }
  0x16   :  { %p876_p9 = pnand %p875_p8, %p869_p5 }
  0x18   :  { %879 = shalt.err (!%p876_p9)
}
  0x19   :  { %79 = dma.hbm_to_vmem [thread:$0]  %s1160_s8, 1024, %s74_s16, [#allocation9], %s969_s28, %s969_s28, %s970_s29  }
  0x1a   :  { %s888_s1 = scalar_lea.vmem %s28_s18, 256  ;;  %p893_p11 = scmp.lt.s32.totalorder %s28_s18, %s28_s18 }
  0x1b   :  { %p889_p10 = scmp.ne.s32.totalorder %s28_s18, %s888_s1  ;;  %p894_p12 = scmp.lt.s32.totalorder %s888_s1, %s888_s1 }
  0x1d   :  { %p895_p13 = por %p894_p12, %p893_p11 }
  0x1f   :  { %p896_p0 = pnand %p895_p13, %p889_p10 }
  0x21   :  { %899 = shalt.err (!%p896_p0)
}
  0x22   :  { %s973_s22 = smov 128   ;;  %s974_s23 = smov 8  }
  0x23   :  { %33 = dma.hbm_to_vmem [thread:$0]  %s1152_s0, 256, %s28_s18, [#allocation3], %s973_s22, %s973_s22, %s974_s23  }
  0x24   :  { %s975_s26 = smov [#allocation7]   ;;  %s976_s8 = smov [#allocation10]  }
  0x25   :  { %s57_s27 = sshll.u32 %s975_s26, 4  ;;  %s89_s30 = sshll.u32 %s976_s8, 4  ;;  %s58_s27 = int_to_ptr.vmem [resolvable:$true] %s57_s27  ;;  %s90_s30 = int_to_ptr.vmem [resolvable:$true] %s89_s30 }
  0x26   :  { %s908_s14 = scalar_lea.vmem %s58_s27, 1024  ;;  %p913_p2 = scmp.lt.s32.totalorder %s58_s27, %s58_s27 }
  0x27   :  { %p909_p1 = scmp.ne.s32.totalorder %s58_s27, %s908_s14  ;;  %p914_p3 = scmp.lt.s32.totalorder %s908_s14, %s908_s14 }
  0x29   :  { %p915_p4 = por %p914_p3, %p913_p2 }
  0x2b   :  { %p916_p5 = pnand %p915_p4, %p909_p1 }
  0x2d   :  { %919 = shalt.err (!%p916_p5)
}
  0x2e   :  { %63 = dma.hbm_to_vmem [thread:$0]  %s1157_s5, 1024, %s58_s27, [#allocation6], %s969_s28, %s969_s28, %s970_s29  }
  0x2f   :  { %s928_s0 = scalar_lea.vmem %s90_s30, 1024  ;;  %p933_p7 = scmp.lt.s32.totalorder %s90_s30, %s90_s30 }
  0x30   :  { %p929_p6 = scmp.ne.s32.totalorder %s90_s30, %s928_s0  ;;  %p934_p8 = scmp.lt.s32.totalorder %s928_s0, %s928_s0 }
  0x32   :  { %p935_p9 = por %p934_p8, %p933_p7 }
  0x34   :  { %p936_p10 = pnand %p935_p9, %p929_p6 }
  0x36   :  { %939 = shalt.err (!%p936_p10)
}
  0x37   :  { %95 = dma.hbm_to_vmem [thread:$0]  %s1163_s11, 1024, %s90_s30, [#allocation9], %s969_s28, %s969_s28, %s970_s29  }
  0x38   :  { %960 = dma.done.wait [#allocation3], 256  }
  0x39   :  { %961 = vsyncadd [#allocation3], 4294967040 }
  0x3a   :  { %962 = dma.done.wait [#allocation6], 1280  }
  0x3b   :  { %963 = vsyncadd [#allocation6], 4294966016 }
  0x3c   :  { %964 = dma.done.wait [#allocation9], 2048  }
  0x3d   :  { %965 = vsyncadd [#allocation9], 4294965248  ;;  %v977_v0 = vmov 0.0   ;;  %vm978_vm0 = vmmov 0   ;;  %v808_v1 = vld [vmem:[#allocation5 + $0x8] sm:$0xff]   ;;  %v809_v2 = vld [vmem:[#allocation5] sm:$0xff]   ;;  %v216_v45 = vlaneseq }
  0x3e   :  { %728 = vmatprep.subr.bf16.mxu0 %v977_v0  ;;  %732 = vmatprep.mubr.msk.bf16.mxu0 %vm978_vm0, %v977_v0  ;;  %v114_v3 = vld [vmem:[#allocation2] sm:$0xff]  ;;  %v115_v4 = vld [vmem:[#allocation2 + $0x8] sm:$0xff]  ;;  %vm140_vm1 = vcmask 261120   ;;  %v810_v6 = vld [vmem:[#allocation7 + $0x38] sm:$0xff]  }
  0x3f   :  { %736 = vmatprep.subr.bf16.mxu1 %v977_v0  ;;  %752 = vmatprep.mubr.msk.bf16.mxu1 %vm978_vm0, %v977_v0  ;;  %v116_v5 = vpack.c.bf16 %v115_v4, %v114_v3  ;;  %v811_v7 = vld [vmem:[#allocation7 + $0x30] sm:$0xff]   ;;  %v812_v8 = vld [vmem:[#allocation7 + $0x28] sm:$0xff]   ;;  %v813_v9 = vld [vmem:[#allocation7 + $0x20] sm:$0xff]   ;;  %v217_v46 = vshrl.u32 %v216_v45, 7 }
  0x40   :  { %729 = vmatpush3.bf16.msra.mxu0 %v808_v1  ;;  %737 = vmatpush3.bf16.msra.mxu1 %v810_v6  ;;  %v814_v10 = vld [vmem:[#allocation7 + $0x18] sm:$0xff]   ;;  %v815_v11 = vld [vmem:[#allocation7 + $0x10] sm:$0xff]   ;;  %v816_v12 = vld [vmem:[#allocation7 + $0x8] sm:$0xff]  }
  0x41   :  { %730 = vmatprep.subr.bf16.mxu0 %v977_v0  ;;  %738 = vmatprep.subr.bf16.mxu1 %v977_v0  ;;  %v817_v13 = vld [vmem:[#allocation7] sm:$0xff]   ;;  %v1104_v48 = vsub.s32 0, %v217_v46  ;;  %v818_v61 = vld [vmem:[#allocation8 + $0x38] sm:$0xff]   ;;  %v819_v62 = vld [vmem:[#allocation8 + $0x30] sm:$0xff]  }
  0x42   :  { %v669_v14 = vld [vmem:[%s1154_s2] ss:$0 sm:$0xff]  ;;  %v820_v63 = vld [vmem:[#allocation8 + $0x28] sm:$0xff]   ;;  %v823_v3 = vld [vmem:[#allocation8 + $0x10] sm:$0xff]  }
  0x43   :  { %v187_v47 = vld [vmem:[%s1155_s3] sm:$0x1]  ;;  %v824_v4 = vld [vmem:[#allocation8 + $0x8] sm:$0xff]  }
  0x44   :  { %731 = vmatpush3.bf16.msra.mxu0 %v809_v2  ;;  %739 = vmatpush3.bf16.msra.mxu1 %v811_v7  ;;  %v188_v51 = vld [vmem:[%s1156_s4] sm:$0x1]  ;;  %v822_v2 = vld [vmem:[#allocation8 + $0x18] sm:$0xff]  }
  0x45   :  { %756 = vmatprep.subr.bf16.mxu0 %v977_v0  ;;  %740 = vmatprep.subr.bf16.mxu1 %v977_v0  ;;  %v821_v1 = vld [vmem:[#allocation8 + $0x20] sm:$0xff]  }
  0x47   :  { %733 = vmatmul.mubr.msk.bf16.vlgmr.msra.gmra.mxu0 %vm140_vm1, %v116_v5  ;;  %v825_v5 = vld [vmem:[#allocation8] sm:$0xff]  }
  0x48   :  { %772 = vmatprep.mubr.msk.bf16.mxu0 %vm978_vm0, %v977_v0  ;;  %741 = vmatpush3.bf16.msra.mxu1 %v812_v8 }
  0x49   :  { %742 = vmatprep.subr.bf16.mxu1 %v977_v0  ;;  %757 = vmatpush3.bf16.msra.mxu0 %v818_v61 }
  0x4a   :  { %758 = vmatprep.subr.bf16.mxu0 %v977_v0 }
  0x4c   :  { %743 = vmatpush3.bf16.msra.mxu1 %v813_v9 }
  0x4d   :  { %744 = vmatprep.subr.bf16.mxu1 %v977_v0  ;;  %759 = vmatpush3.bf16.msra.mxu0 %v819_v62 }
  0x4e   :  { %760 = vmatprep.subr.bf16.mxu0 %v977_v0 }
  0x50   :  { %745 = vmatpush3.bf16.msra.mxu1 %v814_v10 }
  0x51   :  { %746 = vmatprep.subr.bf16.mxu1 %v977_v0  ;;  %761 = vmatpush3.bf16.msra.mxu0 %v820_v63 }
  0x52   :  { %762 = vmatprep.subr.bf16.mxu0 %v977_v0 }
  0x54   :  { %747 = vmatpush3.bf16.msra.mxu1 %v815_v11 }
  0x55   :  { %748 = vmatprep.subr.bf16.mxu1 %v977_v0  ;;  %763 = vmatpush3.bf16.msra.mxu0 %v821_v1 }
  0x56   :  { %764 = vmatprep.subr.bf16.mxu0 %v977_v0 }
  0x58   :  { %749 = vmatpush3.bf16.msra.mxu1 %v816_v12 }
  0x59   :  { %750 = vmatprep.subr.bf16.mxu1 %v977_v0  ;;  %765 = vmatpush3.bf16.msra.mxu0 %v822_v2 }
  0x5a   :  { %766 = vmatprep.subr.bf16.mxu0 %v977_v0 }
  0x5c   :  { %751 = vmatpush3.bf16.msra.mxu1 %v817_v13 }
  0x5d   :  { %776 = vmatprep.subr.bf16.mxu1 %v977_v0  ;;  %767 = vmatpush3.bf16.msra.mxu0 %v823_v3 }
  0x5e   :  { %768 = vmatprep.subr.bf16.mxu0 %v977_v0 }
  0x61   :  { %769 = vmatpush3.bf16.msra.mxu0 %v824_v4 }
  0x62   :  { %770 = vmatprep.subr.bf16.mxu0 %v977_v0 }
  0x65   :  { %771 = vmatpush3.bf16.msra.mxu0 %v825_v5 }
 0x107   :  { %v178_v15 = vpop.f32.mrf.mxu0 }
 0x108   :  { %v179_v16 = vadd.f32 %v669_v14, %v178_v15 }
 0x109   :  { %v734_v17 = vpop.f32.mrf.mxu0 }
 0x10a   :  { %v185_v19 = vmax.f32 %v179_v16, 0.0 }
 0x10b   :  { %v181_v18 = vpop.f32.mrf.mxu0 }
 0x10c   :  { %v182_v20 = vadd.f32 %v669_v14, %v181_v18  ;;  %v197_v23 = vmul.f32 %v185_v19, %v185_v19 }
 0x10d   :  { %v735_v21 = vpop.f32.mrf.mxu0 }
 0x10e   :  { %v186_v22 = vmax.f32 %v182_v20, 0.0 }
 0x110   :  { %v189_v24 = vadd.f32 %v186_v22, %v185_v19  ;;  %v198_v25 = vmul.f32 %v186_v22, %v186_v22 }
 0x112   :  { %v190_v26 = vrot.slane %v189_v24, 4  ;;  %v199_v27 = vadd.f32 %v198_v25, %v197_v23 }
 0x114   :  { %v191_v28 = vadd.f32 %v190_v26, %v189_v24  ;;  %v200_v29 = vrot.slane %v199_v27, 4 }
 0x116   :  { %v192_v30 = vrot.slane %v191_v28, 2  ;;  %v201_v31 = vadd.f32 %v200_v29, %v199_v27 }
 0x118   :  { %v193_v32 = vadd.f32 %v192_v30, %v191_v28  ;;  %v202_v33 = vrot.slane %v201_v31, 2 }
 0x11a   :  { %v194_v34 = vrot.slane %v193_v32, 1  ;;  %v203_v35 = vadd.f32 %v202_v33, %v201_v31 }
 0x11c   :  { %v195_v36 = vadd.f32 %v194_v34, %v193_v32  ;;  %v204_v37 = vrot.slane %v203_v35, 1  ;;  %v337_v32 = vld [vmem:[%s1158_s6] sm:$0x1] }
 0x11e   :  { %v196_v38 = vmul.f32 0.0625, %v195_v36  ;;  %v205_v39 = vadd.f32 %v204_v37, %v203_v35  ;;  %v338_v35 = vld [vmem:[%s1159_s7] sm:$0x1] }
 0x120   :  { %v206_v40 = vmul.f32 0.0625, %v205_v39  ;;  %v207_v41 = vmul.f32 %v196_v38, %v196_v38 }
 0x122   :  { %v208_v42 = vsub.f32 %v206_v40, %v207_v41 }
 0x124   :  { %v209_v43 = vmax.f32 %v208_v42, 0.0 }
 0x126   :  { %v210_v44 = vadd.f32 1e-05, %v209_v43 }
 0x128   :  { %834 = vrsqrt.f32 %v210_v44 }
 0x135   :  { %v835_v49 = vpop.eup %834 }
 0x136   :  { %v212_v50 = vmul.f32 %v835_v49, %v187_v47  ;;  %v826_v47 = vld [vmem:[#allocation10 + $0x38] sm:$0xff]   ;;  %v827_v49 = vld [vmem:[#allocation10 + $0x30] sm:$0xff]  }
 0x138   :  { %v213_v52 = vmul.f32 %v212_v50, %v196_v38  ;;  %v219_v53 = vrot.slane %v212_v50, %v1104_v48  ;;  %v828_v50 = vld [vmem:[#allocation10 + $0x28] sm:$0xff]  }
 0x13a   :  { %v214_v54 = vsub.f32 %v188_v51, %v213_v52  ;;  %v222_v55 = vmul.f32 %v219_v53, %v186_v22  ;;  %v221_v56 = vmul.f32 %v219_v53, %v185_v19  ;;  %v829_v51 = vld [vmem:[#allocation10 + $0x20] sm:$0xff]   ;;  %v830_v52 = vld [vmem:[#allocation10 + $0x18] sm:$0xff]   ;;  %v831_v53 = vld [vmem:[#allocation10 + $0x10] sm:$0xff]  }
 0x13c   :  { %v227_v57 = vrot.slane %v214_v54, %v1104_v48  ;;  %v832_v54 = vld [vmem:[#allocation10 + $0x8] sm:$0xff]  }
 0x13e   :  { %v229_v58 = vadd.f32 %v227_v57, %v221_v56  ;;  %v230_v59 = vadd.f32 %v227_v57, %v222_v55  ;;  %v833_v55 = vld [vmem:[#allocation10] sm:$0xff]  }
 0x140   :  { %v231_v60 = vpack.c.bf16 %v230_v59, %v229_v58 }
 0x142   :  { %753 = vmatmul.mubr.bf16.vlgmr.msra.gmra.mxu1 %v231_v60 }
 0x143   :  { %792 = vmatprep.mubr.msk.bf16.mxu1 %vm978_vm0, %v977_v0  ;;  %777 = vmatpush3.bf16.msra.mxu1 %v826_v47 }
 0x144   :  { %778 = vmatprep.subr.bf16.mxu1 %v977_v0 }
 0x147   :  { %779 = vmatpush3.bf16.msra.mxu1 %v827_v49 }
 0x148   :  { %780 = vmatprep.subr.bf16.mxu1 %v977_v0 }
 0x14b   :  { %781 = vmatpush3.bf16.msra.mxu1 %v828_v50 }
 0x14c   :  { %782 = vmatprep.subr.bf16.mxu1 %v977_v0 }
 0x14f   :  { %783 = vmatpush3.bf16.msra.mxu1 %v829_v51 }
 0x150   :  { %784 = vmatprep.subr.bf16.mxu1 %v977_v0 }
 0x153   :  { %785 = vmatpush3.bf16.msra.mxu1 %v830_v52 }
 0x154   :  { %786 = vmatprep.subr.bf16.mxu1 %v977_v0 }
 0x157   :  { %787 = vmatpush3.bf16.msra.mxu1 %v831_v53 }
 0x158   :  { %788 = vmatprep.subr.bf16.mxu1 %v977_v0 }
 0x15b   :  { %789 = vmatpush3.bf16.msra.mxu1 %v832_v54 }
 0x15c   :  { %790 = vmatprep.subr.bf16.mxu1 %v977_v0 }
 0x15f   :  { %791 = vmatpush3.bf16.msra.mxu1 %v833_v55 }
 0x202   :  { %v330_v6 = vpop.f32.mrf.mxu1 }
 0x203   :  { %v347_v9 = vmul.f32 %v330_v6, %v330_v6 }
 0x204   :  { %v754_v7 = vpop.f32.mrf.mxu1 }
 0x206   :  { %v333_v8 = vpop.f32.mrf.mxu1 }
 0x207   :  { %v339_v10 = vadd.f32 %v333_v8, %v330_v6  ;;  %v348_v11 = vmul.f32 %v333_v8, %v333_v8 }
 0x208   :  { %v755_v12 = vpop.f32.mrf.mxu1 }
 0x209   :  { %v340_v13 = vrot.slane %v339_v10, 4  ;;  %v349_v14 = vadd.f32 %v348_v11, %v347_v9 }
 0x20b   :  { %v341_v15 = vadd.f32 %v340_v13, %v339_v10  ;;  %v350_v16 = vrot.slane %v349_v14, 4 }
 0x20d   :  { %v342_v17 = vrot.slane %v341_v15, 2  ;;  %v351_v18 = vadd.f32 %v350_v16, %v349_v14 }
 0x20f   :  { %v343_v19 = vadd.f32 %v342_v17, %v341_v15  ;;  %v352_v20 = vrot.slane %v351_v18, 2 }
 0x211   :  { %v344_v21 = vrot.slane %v343_v19, 1  ;;  %v353_v22 = vadd.f32 %v352_v20, %v351_v18  ;;  %v489_v18 = vld [vmem:[%s1161_s9] sm:$0x1] }
 0x213   :  { %v345_v23 = vadd.f32 %v344_v21, %v343_v19  ;;  %v354_v24 = vrot.slane %v353_v22, 1  ;;  %v490_v21 = vld [vmem:[%s1162_s10] sm:$0x1]  ;;  %s979_s10 = smov [#allocation11]  }
 0x214   :  { %s655_s26 = sshll.u32 %s979_s10, 4  ;;  %s656_s26 = int_to_ptr.vmem [resolvable:$true] %s655_s26 }
 0x215   :  { %v346_v25 = vmul.f32 0.0625, %v345_v23  ;;  %v355_v26 = vadd.f32 %v354_v24, %v353_v22  ;;  %s940_s27 = scalar_lea.vmem %s656_s26, 256  ;;  %p945_p12 = scmp.lt.s32.totalorder %s656_s26, %s656_s26 }
 0x216   :  { %p941_p11 = scmp.ne.s32.totalorder %s656_s26, %s940_s27  ;;  %p946_p13 = scmp.lt.s32.totalorder %s940_s27, %s940_s27 }
 0x217   :  { %v356_v27 = vmul.f32 0.0625, %v355_v26  ;;  %v357_v28 = vmul.f32 %v346_v25, %v346_v25 }
 0x218   :  { %p947_p0 = por %p946_p13, %p945_p12 }
 0x219   :  { %v358_v29 = vsub.f32 %v356_v27, %v357_v28 }
 0x21a   :  { %p948_p1 = pnand %p947_p0, %p941_p11 }
 0x21b   :  { %v359_v30 = vmax.f32 %v358_v29, 0.0 }
 0x21d   :  { %v360_v31 = vadd.f32 1e-05, %v359_v30 }
 0x21f   :  { %836 = vrsqrt.f32 %v360_v31 }
 0x22c   :  { %v837_v33 = vpop.eup %836 }
 0x22d   :  { %v362_v34 = vmul.f32 %v837_v33, %v337_v32  ;;  %v689_v33 = vld [vmem:[%s1164_s12] ss:$0 sm:$0xff] }
 0x22f   :  { %v363_v36 = vmul.f32 %v362_v34, %v346_v25  ;;  %v369_v37 = vrot.slane %v362_v34, %v1104_v48 }
 0x231   :  { %v364_v38 = vsub.f32 %v338_v35, %v363_v36  ;;  %v371_v39 = vmul.f32 %v369_v37, %v330_v6  ;;  %v372_v40 = vmul.f32 %v369_v37, %v333_v8 }
 0x233   :  { %v377_v41 = vrot.slane %v364_v38, %v1104_v48 }
 0x235   :  { %v379_v42 = vadd.f32 %v377_v41, %v371_v39  ;;  %v380_v43 = vadd.f32 %v377_v41, %v372_v40 }
 0x237   :  { %v382_v44 = vmax.f32 %v380_v43, 0.0  ;;  %v381_v45 = vmax.f32 %v379_v42, 0.0 }
 0x239   :  { %v383_v46 = vpack.c.bf16 %v382_v44, %v381_v45 }
 0x23b   :  { %773 = vmatmul.mubr.bf16.vlgmr.msra.gmra.mxu0 %v383_v46 }
 0x2fb   :  { %v482_v56 = vpop.f32.mrf.mxu0 }
 0x2fc   :  { %v499_v59 = vmul.f32 %v482_v56, %v482_v56 }
 0x2fd   :  { %v774_v57 = vpop.f32.mrf.mxu0 }
 0x2ff   :  { %v485_v58 = vpop.f32.mrf.mxu0 }
 0x300   :  { %v491_v60 = vadd.f32 %v485_v58, %v482_v56  ;;  %v500_v61 = vmul.f32 %v485_v58, %v485_v58 }
 0x301   :  { %v775_v62 = vpop.f32.mrf.mxu0 }
 0x302   :  { %v492_v63 = vrot.slane %v491_v60, 4  ;;  %v501_v1 = vadd.f32 %v500_v61, %v499_v59 }
 0x304   :  { %v493_v2 = vadd.f32 %v492_v63, %v491_v60  ;;  %v502_v3 = vrot.slane %v501_v1, 4 }
 0x306   :  { %v494_v4 = vrot.slane %v493_v2, 2  ;;  %v503_v5 = vadd.f32 %v502_v3, %v501_v1 }
 0x308   :  { %v495_v6 = vadd.f32 %v494_v4, %v493_v2  ;;  %v504_v7 = vrot.slane %v503_v5, 2 }
 0x30a   :  { %v496_v8 = vrot.slane %v495_v6, 1  ;;  %v505_v9 = vadd.f32 %v504_v7, %v503_v5 }
 0x30c   :  { %v497_v0 = vadd.f32 %v496_v8, %v495_v6  ;;  %v506_v10 = vrot.slane %v505_v9, 1 }
 0x30e   :  { %v498_v11 = vmul.f32 0.0625, %v497_v0  ;;  %v507_v12 = vadd.f32 %v506_v10, %v505_v9 }
 0x310   :  { %v508_v13 = vmul.f32 0.0625, %v507_v12  ;;  %v509_v14 = vmul.f32 %v498_v11, %v498_v11 }
 0x312   :  { %v510_v15 = vsub.f32 %v508_v13, %v509_v14 }
 0x314   :  { %v511_v16 = vmax.f32 %v510_v15, 0.0 }
 0x316   :  { %v512_v17 = vadd.f32 1e-05, %v511_v16 }
 0x318   :  { %838 = vrsqrt.f32 %v512_v17 }
 0x325   :  { %v839_v19 = vpop.eup %838 }
 0x326   :  { %v514_v20 = vmul.f32 %v839_v19, %v489_v18 }
 0x328   :  { %v515_v22 = vmul.f32 %v514_v20, %v498_v11  ;;  %v521_v23 = vrot.slane %v514_v20, %v1104_v48 }
 0x32a   :  { %v516_v24 = vsub.f32 %v490_v21, %v515_v22  ;;  %v523_v25 = vmul.f32 %v521_v23, %v482_v56  ;;  %v524_v26 = vmul.f32 %v521_v23, %v485_v58 }
 0x32c   :  { %v529_v27 = vrot.slane %v516_v24, %v1104_v48 }
 0x32e   :  { %v531_v28 = vadd.f32 %v529_v27, %v523_v25  ;;  %v532_v29 = vadd.f32 %v529_v27, %v524_v26 }
 0x330   :  { %v534_v30 = vmax.f32 %v532_v29, 0.0  ;;  %v533_v31 = vmax.f32 %v531_v28, 0.0 }
 0x332   :  { %v535_v32 = vpack.c.bf16 %v534_v30, %v533_v31 }
 0x334   :  { %793 = vmatmul.mubr.bf16.vlgmr.msra.gmra.mxu1 %v535_v32 }
 0x3f4   :  { %v641_v34 = vpop.f32.mrf.mxu1 }
 0x3f5   :  { %v642_v35 = vadd.f32 %v689_v33, %v641_v34 }
 0x3f6   :  { %v794_v36 = vpop.f32.mrf.mxu1 }
 0x3f7   :  { %648 = vst [vmem:[#allocation11] sm:$0xff] %v642_v35 }
 0x3f8   :  { %v644_v37 = vpop.f32.mrf.mxu1 }
 0x3f9   :  { %v645_v38 = vadd.f32 %v689_v33, %v644_v37 }
 0x3fa   :  { %v795_v48 = vpop.f32.mrf.mxu1 }
 0x3fb   :  { %649 = vst [vmem:[#allocation11 + $0x8] sm:$0xff] %v645_v38 }
 0x3fc   :  { %951 = shalt.err (!%p948_p1)
}
 0x3fd   :  { %661 = dma.vmem_to_hbm [thread:$0]  %s656_s26, 256, %s1165_s13, [#allocation4], %s973_s22, %s973_s22, %s974_s23  }
 0x3fe   :  { %966 = dma.done.wait [#allocation4], 256  }
 0x3ff   :  { %967 = vsyncadd [#allocation4], 4294967040 }
 0x400   :  { %665 = vsyncpa [#allocation3], 1 }
 0x401   :  { %666 = vsyncpa [#allocation6], 1 }
 0x402   :  { %667 = vsyncpa [#allocation9], 1 }
 0x403   :  { %668 = vsyncpa [#allocation4], 1 }

</bundles_post_ra>
